<compile_context>
chip_gen: v7x
topology: tpu7x:2x2x1
jax: 0.10.0
libtpu: 0.0.40
codegen_flags: <defaults>
</compile_context>

<pallas_src>
import jax
import jax.numpy as jnp
from jax.experimental import pallas as pl
from jax.experimental.pallas import tpu as pltpu


def _spatial_attention_kernel(x_ref, w_ref, b_ref, o_ref):
    """One (batch, spatial-tile) block.

    x_ref: (1, C, THW) VMEM -- C on sublanes, H*W on lanes (lane-dense)
    w_ref: (1, C)      VMEM -- 1x1-conv weight, single output channel
    b_ref: (1,)        SMEM -- bias scalar (f32)
    o_ref: (1, C, THW) VMEM
    """
    x = x_ref[0]                                                  # (C, THW), native dtype
    # 1x1 conv == per-pixel dot over channels, on the MXU with f32 accumulation.
    logit = jnp.dot(w_ref[...], x, preferred_element_type=jnp.float32)  # (1, THW)
    logit = logit + b_ref[0]
    attn = jax.nn.sigmoid(logit)                                  # (1, THW) f32
    # Gate in the input dtype; broadcast the single attention row over C sublanes.
    o_ref[0] = x * attn.astype(x.dtype)


def _choose_tile_hw(hw, c, itemsize, target_block_bytes):
    """Largest lane-dense spatial tile with C * tile * itemsize <= target."""
    max_tile = max(128, (target_block_bytes // max(1, c * itemsize)) // 128 * 128)
    if hw <= 128:
        return hw                       # equals the full dim: no 128-divisibility needed
    if hw % 128 == 0:
        return min(max_tile, hw)
    # Not a multiple of 128: tile must be a multiple of 128; the last (partial)
    # block is handled by Pallas (padded reads, masked writes).
    return min(max_tile, (hw // 128) * 128)


def spatial_attention(x_nchw, weight, bias, *, target_block_bytes=4 * 1024 * 1024):
    """x_nchw: (B, C, H, W); weight: (C,) (squeezed (1,C,1,1) conv weight); bias: ()."""
    B, C, H, W = x_nchw.shape
    HW = H * W

    # NCHW-native: a free, contiguous reshape (no transposes, no extra HBM pass).
    x3 = x_nchw.reshape(B, C, HW)

    tile_hw = _choose_tile_hw(HW, C, x3.dtype.itemsize, target_block_bytes)
    grid_hw = pl.cdiv(HW, tile_hw)

    w2d = weight.reshape(1, C).astype(x3.dtype)
    b1d = bias.reshape(1).astype(jnp.float32)

    out3 = pl.pallas_call(
        _spatial_attention_kernel,
        out_shape=jax.ShapeDtypeStruct((B, C, HW), x3.dtype),
        grid=(B, grid_hw),
        in_specs=[
            pl.BlockSpec((1, C, tile_hw), lambda b, j: (b, 0, j)),   # x tile
            pl.BlockSpec((1, C), lambda b, j: (0, 0)),               # weight (VMEM-resident)
            pl.BlockSpec(memory_space=pltpu.MemorySpace.SMEM),       # bias scalar in SMEM
        ],
        out_specs=pl.BlockSpec((1, C, tile_hw), lambda b, j: (b, 0, j)),
        compiler_params=pltpu.CompilerParams(
            dimension_semantics=("parallel", "parallel")),
    )(x3, w2d, b1d)

    return out3.reshape(B, C, H, W)


if __name__ == "__main__":
    B, C, H, W = 2, 4, 16, 16
    key = jax.random.PRNGKey(0)
    kx, kw, kb = jax.random.split(key, 3)

    x = jax.random.normal(kx, (B, C, H, W), dtype=jnp.float32)
    # Deterministic Conv2d(in_channels=C, out_channels=1, kernel_size=1) params.
    weight = jax.random.normal(kw, (C,), dtype=jnp.float32) * 0.1   # (1,C,1,1) squeezed
    bias = jax.random.normal(kb, (), dtype=jnp.float32) * 0.1

    fn = jax.jit(spatial_attention)
    out = jax.block_until_ready(fn(x, weight, bias))

    # Reference check in plain JAX (same math as the PyTorch module).
    logit = jnp.einsum("bchw,c->bhw", x, weight) + bias
    ref = x * jax.nn.sigmoid(logit)[:, None, :, :]
    assert out.shape == (B, C, H, W)
    assert jnp.allclose(out, ref, atol=1e-5, rtol=1e-5)

    print("KERNEL_OK")
</pallas_src>

<mosaic_0001>
module attributes {stable_mosaic.version = 11 : i64} {
  func.func @_spatial_attention_kernel(%arg0: i32, %arg1: i32, %arg2: memref<1x4x256xf32, #tpu.memory_space<vmem>>, %arg3: memref<1x4xf32, #tpu.memory_space<vmem>>, %arg4: memref<1xf32, #tpu.memory_space<smem>>, %arg5: memref<1x4x256xf32, #tpu.memory_space<vmem>>) attributes {dimension_semantics = [#tpu.dimension_semantics<parallel>, #tpu.dimension_semantics<parallel>], iteration_bounds = array<i64: 2, 1>, scalar_prefetch = 0 : i64, scratch_operands = 0 : i64, tpu.core_type = #tpu.core_type<tc>, window_params = [{transform_indices = @transform_0, window_bounds = array<i64: 1, 4, 256>}, {pipeline_mode = #tpu.pipeline_mode<synchronous>, transform_indices = @transform_1, window_bounds = array<i64: 1, 4>}, {transform_indices = @transform_2, window_bounds = array<i64: 1>}, {transform_indices = @transform_3, window_bounds = array<i64: 1, 4, 256>}]} {
    %c0 = arith.constant 0 : index
    %c0_0 = arith.constant 0 : index
    %c0_1 = arith.constant 0 : index
    %0 = vector.load %arg2[%c0, %c0_0, %c0_1] : memref<1x4x256xf32, #tpu.memory_space<vmem>>, vector<1x4x256xf32>
    %1 = vector.shape_cast %0 : vector<1x4x256xf32> to vector<4x256xf32>
    %c0_2 = arith.constant 0 : index
    %c0_3 = arith.constant 0 : index
    %2 = vector.load %arg3[%c0_2, %c0_3] : memref<1x4xf32, #tpu.memory_space<vmem>>, vector<1x4xf32>
    %cst = arith.constant dense<0.000000e+00> : vector<1x256xf32>
    %3 = tpu.matmul %2, %1, %cst {dimension_numbers = #tpu.dot_dimension_numbers<[1], [0], [0], [1], [0, 0, 1, 1], [], []>} : vector<1x4xf32>, vector<4x256xf32>, vector<1x256xf32> -> vector<1x256xf32>
    %c0_4 = arith.constant 0 : index
    %4 = memref.load %arg4[%c0_4] : memref<1xf32, #tpu.memory_space<smem>>
    %5 = vector.broadcast %4 : f32 to vector<1x256xf32>
    %6 = arith.addf %3, %5 : vector<1x256xf32>
    %7 = arith.negf %6 : vector<1x256xf32>
    %8 = math.exp %7 : vector<1x256xf32>
    %cst_5 = arith.constant 1.000000e+00 : f32
    %9 = vector.broadcast %cst_5 : f32 to vector<1x256xf32>
    %10 = arith.addf %9, %8 : vector<1x256xf32>
    %11 = arith.divf %9, %10 : vector<1x256xf32>
    %12 = vector.broadcast %11 : vector<1x256xf32> to vector<4x256xf32>
    %13 = arith.mulf %1, %12 : vector<4x256xf32>
    %c0_6 = arith.constant 0 : index
    %c0_7 = arith.constant 0 : index
    %c0_8 = arith.constant 0 : index
    %14 = vector.load %arg5[%c0_6, %c0_7, %c0_8] : memref<1x4x256xf32, #tpu.memory_space<vmem>>, vector<1x4x256xf32>
    %15 = vector.shape_cast %14 : vector<1x4x256xf32> to vector<4x256xf32>
    %16 = vector.shape_cast %13 : vector<4x256xf32> to vector<1x4x256xf32>
    tpu.vector_store %arg5[%c0_6, %c0_7, %c0_8], %16 {strides = array<i32>} : memref<1x4x256xf32, #tpu.memory_space<vmem>>, vector<1x4x256xf32>,
    return
  }
  func.func @transform_0(%arg0: i32, %arg1: i32) -> (i32, i32, i32) {
    %c0_i32 = arith.constant 0 : i32
    %c0_i32_0 = arith.constant 0 : i32
    return %arg0, %c0_i32, %arg1 : i32, i32, i32
  }
  func.func @transform_1(%arg0: i32, %arg1: i32) -> (i32, i32) {
    %c0_i32 = arith.constant 0 : i32
    %c0_i32_0 = arith.constant 0 : i32
    %c0_i32_1 = arith.constant 0 : i32
    return %c0_i32, %c0_i32_0 : i32, i32
  }
  func.func @transform_2(%arg0: i32, %arg1: i32) -> i32 {
    %c0_i32 = arith.constant 0 : i32
    %c0_i32_0 = arith.constant 0 : i32
    return %c0_i32 : i32
  }
  func.func @transform_3(%arg0: i32, %arg1: i32) -> (i32, i32, i32) {
    %c0_i32 = arith.constant 0 : i32
    %c0_i32_0 = arith.constant 0 : i32
    return %arg0, %c0_i32, %arg1 : i32, i32, i32
  }
}

</mosaic_0001>

<bundles_post_ra>
// kernel: spatial_attention.1
= control target key start
LH: loop header
LB: loop body
LE: loop exit
PB: predicated region body
PF: predicated region fallthrough
CT: control target
= control target key end

     0   :  { %s510_s14 = smov 0   ;;  %s512_s15 = smov 0   ;;  %s553_s0 = inlined_call_operand.vmem [shape: f32[2,4,256], index: 0, kind: input, shape index: {}]   ;;  %s554_s1 = inlined_call_operand.vmem [shape: f32[1,4], index: 1, kind: input, shape index: {}]   ;;  %s555_s2 = inlined_call_operand.<no memory space> [shape: f32[1], index: 2, kind: input, shape index: {}]   ;;  %s556_s3 = inlined_call_operand.vmem [shape: f32[2,4,256], index: 3, kind: output, shape index: {}]  }
   0x1   :  { %8 = sst [smem:[#allocation2]] %s555_s2  ;;  %s514_s16 = smov 0  }
   0x2 LB: > { %s26_s2 = sadd.s32 1, %s480_s15  ;;  %p414_p0 = scmp.ge.s32.totalorder %s484_s16, 1  ;;  %s484_s16 = sphi %s514_s16, %s14_s16   ;;  %s480_s15 = sphi %s512_s15, %s558_s15   ;;  %s476_s14 = sphi %s510_s14, %s557_s14  }
   0x3   : > { %p28_p1 = scmp.ge.s32.totalorder %s26_s2, 2  ;;  %p159_p2 = scmp.lt.s32.totalorder %s484_s16, 3 }
   0x5   : > { %s560_s2 = smov (%p28_p1, %s26_s2), 0  ;;  %p160_p3 = pnand %p414_p0, %p159_p2 }
   0x6   : > { %p192_p4 = scmp.lt.s32.totalorder (!%p160_p3), %s476_s14, 1  ;;  %v486_v0 = vmov (!%p160_p3), 0.0   ;;  %vm221_vm0 = vcmask (!%p160_p3), 1043456   ;;  %v212_v3 = vld [vmem:[%s554_s1] sm:$0x1] (!%p160_p3)  ;;  %vm217_vm1 = vcmask (!%p160_p3), 31744   ;;  %v309_v14 = vlaneseq (!%p160_p3) }
   0x7   : > { %163 = sbr.rel (%p160_p3) target bundleno = 270 (0x10e), region = 32  ;;  %290 = vmatprep.mubr.f32.mxu0 (!%p160_p3), %v486_v0  ;;  %s213_s23 = sld [smem:[#allocation2]] (!%p160_p3) }
   0x8   : > { %v310_v16 = vshrl.u32 (!%p160_p3), %v309_v14, 7 }
   0xa   : > { %v311_v17 = vsub.s32 (!%p160_p3), 0, %v310_v16 }
   0xd   : > { %v214_v4 = vstv (!%p160_p3), %s213_s23 }
   0xe   : > { %s562_s14 = smov (!%p192_p4, %s476_s14), 1 }
   0xf   : > { %s426_s17 = sshll.u32 %s562_s14, 3 }
  0x10   : > { %s199_s20 = scalar_lea.vmem %s553_s0, %s426_s17  ;;  %s209_s26 = scalar_lea.vmem %s556_s3, %s426_s17 }
  0x11   : > { %v211_v1 = vld [vmem:[%s199_s20] sm:$0xff] }
  0x12   : > { %v216_v2 = vcombine.high %v211_v1, %v211_v1 }
  0x14   : > { %419 = vmatprep.subr.msk.mxu0 %vm221_vm0, %v216_v2 }
  0x15   : > { %420 = vmatpush1.msk.msra.mxu0 %vm221_vm0, %v211_v1 }
  0x16   : > { %421 = vmatmul.mubr.msk.f32.vlgmr.msra.gmra.mrb[0].mxu0 %vm217_vm1, %v212_v3 }
  0xe9   : > { %v292_v5 = vpop.f32.mrb[0].mxu0 }
  0xea   : > { %v293_v6 = vadd.f32 %v292_v5, %v214_v4  ;;  %v294_v7 = vpop.f32.mrb[1].mxu0 }
  0xeb   : > { %v295_v8 = vadd.f32 %v294_v7, %v214_v4 }
  0xec   : > { %v422_v9 = vmul.f32 -1.442695, %v293_v6 }
  0xed   : > { %v423_v10 = vmul.f32 -1.442695, %v295_v8 }
  0xee   : > { %454 = vpow2.f32 %v422_v9 }
  0xef   : > { %456 = vpow2.f32 %v423_v10 }
  0xf8   : > { %v455_v11 = vpop.eup %454 }
  0xf9   : > { %v457_v12 = vpop.eup %456  ;;  %v303_v13 = vadd.f32 1.0, %v455_v11 }
  0xfa   : > { %v304_v15 = vadd.f32 1.0, %v457_v12 }
  0xfb   : > { %458 = vrcp.f32 %v303_v13 }
  0xfc   : > { %460 = vrcp.f32 %v304_v15 }
 0x105   : > { %v459_v18 = vpop.eup %458 }
 0x106   : > { %v461_v19 = vpop.eup %460  ;;  %v312_v20 = vrot.slane %v459_v18, %v311_v17 }
 0x107   : > { %v316_v21 = vrot.slane %v461_v19, %v311_v17 }
 0x109   : > { %v319_v22 = vcombine.low %v312_v20, %v316_v21 }
 0x10b   : > { %v321_v23 = vmul.f32 %v319_v22, %v211_v1 }
 0x10d   : > { %322 = vst [vmem:[%s209_s26] sm:$0xff] %v321_v23 }
 0x10e PF: > { %s14_s16 = sadd.s32 1, %s484_s16   ;;  %s557_s14 = smov %s480_s15 }
 0x10f   : > { %p11_p5 = scmp.ge.s32.totalorder %s14_s16, 4   ;;  %s558_s15 = smov %s560_s2 }
 0x111   :  { %13 = sbr.rel (!%p11_p5) target bundleno = 2 (0x2), region = 62 }

</bundles_post_ra>
